<compile_context>
chip_gen: v5e
topology: v5e:2x2
jax: 0.10.0
libtpu: 0.0.40
codegen_flags: <defaults>
</compile_context>

<pallas_src>
import jax
import jax.numpy as jnp
from jax.experimental import pallas as pl
from jax.experimental.pallas import tpu as pltpu


def mlp_tanh_kernel(x_ref, w1t_ref, b1_ref, w2t_ref, b2_ref, o_ref):
    # x_ref:   (TB, F)
    # w1t_ref: (F, H)   b1_ref: (1, H)      (weights pre-transposed at init)
    # w2t_ref: (H, F)   b2_ref: (1, F)
    # o_ref:   (TB, F)
    x = x_ref[...]

    # layer1: h = x @ W1^T  (natural contraction, no in-kernel relayout), +bias, ReLU.
    h = jnp.dot(x, w1t_ref[...], preferred_element_type=jnp.float32)
    h = jnp.maximum(h + b1_ref[...], 0.0)          # bias broadcast + ReLU on VPU

    # layer2: y = h @ W2^T, +bias, Tanh (EUP).
    w2t = w2t_ref[...]
    if h.dtype != w2t.dtype:                       # only matters for bf16 params
        h = h.astype(w2t.dtype)
    y = jnp.dot(h, w2t, preferred_element_type=jnp.float32)
    y = jnp.tanh(y + b2_ref[...])

    o_ref[...] = y if y.dtype == o_ref.dtype else y.astype(o_ref.dtype)


def prepare_mlp_tanh_params(w1, b1, w2, b2):
    """One-time (init-time) layout transform of torch nn.Linear parameters.

    w1: (H, F) torch layout (out, in)   b1: (H,)
    w2: (F, H)                          b2: (F,)
    Returns (w1t, b1_2d, w2t, b2_2d) = ((F,H), (1,H), (H,F), (1,F)).
    Call this once when the model is built, NOT per forward call.
    """
    H, F = w1.shape
    return w1.T, b1.reshape(1, H), w2.T, b2.reshape(1, F)


# Batch-tile budget: at F=32 f32 this is a 512 KiB x tile + 512 KiB out tile,
# double-buffered -> ~2 MiB, far under v5e/v6e/v7x scoped VMEM limits.
_MAX_TB = 4096


def _pick_batch_tile(B):
    """Choose the batch tile: big tiles to amortize per-grid-step overhead,
    even number of steps (when >1) so v7x megacore balances across 2 TCs."""
    if B <= _MAX_TB:
        return B                                   # single grid step
    steps = pl.cdiv(B, _MAX_TB)
    if steps % 2:                                  # even step count for v7x
        steps += 1
    tb = ((B + steps - 1) // steps + 7) // 8 * 8   # ceil, rounded to 8 sublanes
    return tb


def mlp_tanh(x, w1t, b1_2d, w2t, b2_2d):
    """Fused MLP_Tanh forward.  Params must come from prepare_mlp_tanh_params."""
    B, F = x.shape
    H = w1t.shape[1]

    tb = _pick_batch_tile(B)
    grid = (pl.cdiv(B, tb),)

    itemsize = jnp.dtype(x.dtype).itemsize
    cost = pl.CostEstimate(
        flops=2 * B * (F * H + H * F),
        transcendentals=B * F,
        bytes_accessed=(2 * B * F + 2 * F * H + H + F) * itemsize,
    )

    return pl.pallas_call(
        mlp_tanh_kernel,
        out_shape=jax.ShapeDtypeStruct((B, F), x.dtype),
        grid_spec=pl.GridSpec(
            grid=grid,
            in_specs=[
                pl.BlockSpec((tb, F), lambda i: (i, 0)),   # x: tiled over batch
                pl.BlockSpec((F, H), lambda i: (0, 0)),    # W1^T: VMEM-resident
                pl.BlockSpec((1, H), lambda i: (0, 0)),    # b1:   resident
                pl.BlockSpec((H, F), lambda i: (0, 0)),    # W2^T: resident
                pl.BlockSpec((1, F), lambda i: (0, 0)),    # b2:   resident
            ],
            out_specs=pl.BlockSpec((tb, F), lambda i: (i, 0)),
        ),
        compiler_params=pltpu.CompilerParams(
            # Batch tiles are independent -> parallel (shards across v7x's 2 TCs
            # when grid has >=2 steps; neutral on single-TC v5e/v6e).
            dimension_semantics=("parallel",),
        ),
        cost_estimate=cost,
    )(x, w1t, b1_2d, w2t, b2_2d)


if __name__ == "__main__":
    # Module config: feature_size=32, feature_multipier=2 -> hidden=64, batch=8.
    feature_size = 32
    feature_multiplier = 2
    hidden = feature_size * feature_multiplier
    batch = 8

    key = jax.random.PRNGKey(0)
    kx, k1, k2, k3, k4 = jax.random.split(key, 5)

    x = jax.random.normal(kx, (batch, feature_size), dtype=jnp.float32)

    # Deterministic torch-style parameter init (W is (out, in)).
    bound1 = 1.0 / (feature_size ** 0.5)
    w1 = jax.random.uniform(k1, (hidden, feature_size), jnp.float32, -bound1, bound1)
    b1 = jax.random.uniform(k2, (hidden,), jnp.float32, -bound1, bound1)
    bound2 = 1.0 / (hidden ** 0.5)
    w2 = jax.random.uniform(k3, (feature_size, hidden), jnp.float32, -bound2, bound2)
    b2 = jax.random.uniform(k4, (feature_size,), jnp.float32, -bound2, bound2)

    # One-time layout prep (init-time cost, outside the per-call path).
    w1t, b1_2d, w2t, b2_2d = jax.block_until_ready(
        prepare_mlp_tanh_params(w1, b1, w2, b2))

    out = mlp_tanh(x, w1t, b1_2d, w2t, b2_2d)
    out = jax.block_until_ready(out)

    # Reference check in plain JAX (same math as the PyTorch forward).
    ref = jnp.tanh(jnp.maximum(x @ w1.T + b1, 0.0) @ w2.T + b2)
    assert out.shape == (batch, feature_size)
    assert jnp.allclose(out, ref, atol=1e-5, rtol=1e-5)

    print("KERNEL_OK")
</pallas_src>

<mosaic_0001>
module attributes {stable_mosaic.version = 11 : i64} {
  func.func @mlp_tanh_kernel(%arg0: i32, %arg1: memref<8x32xf32, #tpu.memory_space<vmem>>, %arg2: memref<32x64xf32, #tpu.memory_space<vmem>>, %arg3: memref<1x64xf32, #tpu.memory_space<vmem>>, %arg4: memref<64x32xf32, #tpu.memory_space<vmem>>, %arg5: memref<1x32xf32, #tpu.memory_space<vmem>>, %arg6: memref<8x32xf32, #tpu.memory_space<vmem>>) attributes {dimension_semantics = [#tpu.dimension_semantics<parallel>], iteration_bounds = array<i64: 1>, scalar_prefetch = 0 : i64, scratch_operands = 0 : i64, tpu.core_type = #tpu.core_type<tc>, window_params = [{transform_indices = @transform_0, window_bounds = array<i64: 8, 32>}, {pipeline_mode = #tpu.pipeline_mode<synchronous>, transform_indices = @transform_1, window_bounds = array<i64: 32, 64>}, {pipeline_mode = #tpu.pipeline_mode<synchronous>, transform_indices = @transform_2, window_bounds = array<i64: 1, 64>}, {pipeline_mode = #tpu.pipeline_mode<synchronous>, transform_indices = @transform_3, window_bounds = array<i64: 64, 32>}, {pipeline_mode = #tpu.pipeline_mode<synchronous>, transform_indices = @transform_4, window_bounds = array<i64: 1, 32>}, {transform_indices = @transform_5, window_bounds = array<i64: 8, 32>}]} {
    %c0 = arith.constant 0 : index
    %c0_0 = arith.constant 0 : index
    %0 = vector.load %arg1[%c0, %c0_0] : memref<8x32xf32, #tpu.memory_space<vmem>>, vector<8x32xf32>
    %c0_1 = arith.constant 0 : index
    %c0_2 = arith.constant 0 : index
    %1 = vector.load %arg2[%c0_1, %c0_2] : memref<32x64xf32, #tpu.memory_space<vmem>>, vector<32x64xf32>
    %cst = arith.constant dense<0.000000e+00> : vector<8x64xf32>
    %2 = tpu.matmul %0, %1, %cst {dimension_numbers = #tpu.dot_dimension_numbers<[1], [0], [0], [1], [0, 0, 1, 1], [], []>} : vector<8x32xf32>, vector<32x64xf32>, vector<8x64xf32> -> vector<8x64xf32>
    %c0_3 = arith.constant 0 : index
    %c0_4 = arith.constant 0 : index
    %3 = vector.load %arg3[%c0_3, %c0_4] : memref<1x64xf32, #tpu.memory_space<vmem>>, vector<1x64xf32>
    %4 = vector.broadcast %3 : vector<1x64xf32> to vector<8x64xf32>
    %5 = arith.addf %2, %4 : vector<8x64xf32>
    %cst_5 = arith.constant 0.000000e+00 : f32
    %6 = vector.broadcast %cst_5 : f32 to vector<8x64xf32>
    %7 = arith.maximumf %5, %6 : vector<8x64xf32>
    %c0_6 = arith.constant 0 : index
    %c0_7 = arith.constant 0 : index
    %8 = vector.load %arg4[%c0_6, %c0_7] : memref<64x32xf32, #tpu.memory_space<vmem>>, vector<64x32xf32>
    %cst_8 = arith.constant dense<0.000000e+00> : vector<8x32xf32>
    %9 = tpu.matmul %7, %8, %cst_8 {dimension_numbers = #tpu.dot_dimension_numbers<[1], [0], [0], [1], [0, 0, 1, 1], [], []>} : vector<8x64xf32>, vector<64x32xf32>, vector<8x32xf32> -> vector<8x32xf32>
    %c0_9 = arith.constant 0 : index
    %c0_10 = arith.constant 0 : index
    %10 = vector.load %arg5[%c0_9, %c0_10] : memref<1x32xf32, #tpu.memory_space<vmem>>, vector<1x32xf32>
    %11 = vector.broadcast %10 : vector<1x32xf32> to vector<8x32xf32>
    %12 = arith.addf %9, %11 : vector<8x32xf32>
    %13 = math.tanh %12 : vector<8x32xf32>
    %c0_11 = arith.constant 0 : index
    %c0_12 = arith.constant 0 : index
    %14 = vector.load %arg6[%c0_11, %c0_12] : memref<8x32xf32, #tpu.memory_space<vmem>>, vector<8x32xf32>
    tpu.vector_store %arg6[%c0_11, %c0_12], %13 {strides = array<i32>} : memref<8x32xf32, #tpu.memory_space<vmem>>, vector<8x32xf32>,
    return
  }
  func.func @transform_0(%arg0: i32) -> (i32, i32) {
    %c0_i32 = arith.constant 0 : i32
    %c0_i32_0 = arith.constant 0 : i32
    return %arg0, %c0_i32 : i32, i32
  }
  func.func @transform_1(%arg0: i32) -> (i32, i32) {
    %c0_i32 = arith.constant 0 : i32
    %c0_i32_0 = arith.constant 0 : i32
    %c0_i32_1 = arith.constant 0 : i32
    return %c0_i32, %c0_i32_0 : i32, i32
  }
  func.func @transform_2(%arg0: i32) -> (i32, i32) {
    %c0_i32 = arith.constant 0 : i32
    %c0_i32_0 = arith.constant 0 : i32
    %c0_i32_1 = arith.constant 0 : i32
    return %c0_i32, %c0_i32_0 : i32, i32
  }
  func.func @transform_3(%arg0: i32) -> (i32, i32) {
    %c0_i32 = arith.constant 0 : i32
    %c0_i32_0 = arith.constant 0 : i32
    %c0_i32_1 = arith.constant 0 : i32
    return %c0_i32, %c0_i32_0 : i32, i32
  }
  func.func @transform_4(%arg0: i32) -> (i32, i32) {
    %c0_i32 = arith.constant 0 : i32
    %c0_i32_0 = arith.constant 0 : i32
    %c0_i32_1 = arith.constant 0 : i32
    return %c0_i32, %c0_i32_0 : i32, i32
  }
  func.func @transform_5(%arg0: i32) -> (i32, i32) {
    %c0_i32 = arith.constant 0 : i32
    %c0_i32_0 = arith.constant 0 : i32
    return %arg0, %c0_i32 : i32, i32
  }
}

</mosaic_0001>

<bundles_post_ra>
// kernel: tpu_custom_call.1
= control target key start
LH: loop header
LB: loop body
LE: loop exit
PB: predicated region body
PF: predicated region fallthrough
CT: control target
= control target key end

     0   :  { %s223_s0 = inlined_call_operand.vmem [shape: f32[8,32], index: 0, kind: input, shape index: {}]   ;;  %s224_s1 = inlined_call_operand.vmem [shape: f32[32,64], index: 1, kind: input, shape index: {}]   ;;  %s225_s2 = inlined_call_operand.vmem [shape: f32[1,64], index: 2, kind: input, shape index: {}]   ;;  %s226_s3 = inlined_call_operand.vmem [shape: f32[64,32], index: 3, kind: input, shape index: {}]   ;;  %s227_s4 = inlined_call_operand.vmem [shape: f32[1,32], index: 4, kind: input, shape index: {}]   ;;  %s228_s5 = inlined_call_operand.hbm [shape: f32[8,32], index: 5, kind: output, shape index: {}]  }
   0x1   :  { %v25_v0 = vld [vmem:[%s224_s1 + $0x18] sm:$0xff]  ;;  %v24_v1 = vld [vmem:[%s224_s1 + $0x10] sm:$0xff]  ;;  %v23_v3 = vld [vmem:[%s224_s1 + $0x8] sm:$0xff] }
   0x2   :  { %46 = vmatpush.msra.mxu0 %v25_v0  ;;  %v62_v2 = vld [vmem:[%s226_s3 + $0x38] sm:$0xff]  ;;  %v61_v4 = vld [vmem:[%s226_s3 + $0x30] sm:$0xff]  ;;  %v60_v5 = vld [vmem:[%s226_s3 + $0x28] sm:$0xff] }
   0x3   :  { %79 = vmatpush.msra.mxu1 %v62_v2  ;;  %v22_v6 = vld [vmem:[%s224_s1] sm:$0xff] }
   0x4   :  { %47 = vmatpush.msra.mxu0 %v24_v1 }
   0x5   :  { %80 = vmatpush.msra.mxu1 %v61_v4 }
   0x6   :  { %10 = vsyncpa [#allocation3], 0  ;;  %48 = vmatpush.msra.mxu0 %v23_v3  ;;  %v21_v7 = vld [vmem:[%s223_s0] sm:$0xff]  ;;  %vm30_vm0 = vcmask 261120   ;;  %v58_v9 = vld [vmem:[%s226_s3 + $0x18] sm:$0xff]  ;;  %vm67_vm1 = vcmask 523264  }
   0x7   :  { %v59_v8 = vld [vmem:[%s226_s3 + $0x20] sm:$0xff]  ;;  %81 = vmatpush.msra.mxu1 %v60_v5  ;;  %v57_v10 = vld [vmem:[%s226_s3 + $0x10] sm:$0xff]  ;;  %v56_v11 = vld [vmem:[%s226_s3 + $0x8] sm:$0xff]  ;;  %s142_s21 = smov [#allocation2]   ;;  %s100_s24 = sshll.u32 %s228_s5, 4  ;;  %s101_s24 = int_to_ptr.hbm [resolvable:$true] %s100_s24 }
   0x8   :  { %49 = vmatpush.msra.mxu0 %v22_v6  ;;  %v55_v12 = vld [vmem:[%s226_s3] sm:$0xff]  ;;  %s98_s22 = sshll.u32 %s142_s21, 4  ;;  %s99_s22 = int_to_ptr.vmem [resolvable:$true] %s98_s22 }
   0x9   :  { %109 = vmatmul.msk.f32.vlgmr.msra.gmra.mxu0 %vm30_vm0, %v21_v7  ;;  %82 = vmatpush.msra.mxu1 %v59_v8  ;;  %v112_v13 = vld [vmem:[%s225_s2] ss:$0 sm:$0xff] }
   0xa   :  { %v113_v17 = vld [vmem:[%s227_s4] ss:$0 sm:$0xff] }
   0xb   :  { %83 = vmatpush.msra.mxu1 %v58_v9 }
   0xd   :  { %84 = vmatpush.msra.mxu1 %v57_v10 }
   0xf   :  { %85 = vmatpush.msra.mxu1 %v56_v11 }
  0x11   :  { %86 = vmatpush.msra.mxu1 %v55_v12 }
  0x86   :  { %v51_v14 = vpop.f32.mrf.mxu0 }
  0x87   :  { %v52_v15 = vadd.f32 %v112_v13, %v51_v14 }
  0x89   :  { %v54_v16 = vmax.f32 %v52_v15, 0.0 }
  0x8b   :  { %110 = vmatmul.msk.f32.vlgmr.msra.gmra.mxu1 %vm67_vm1, %v54_v16 }
 0x108   :  { %v88_v18 = vpop.f32.mrf.mxu1 }
 0x109   :  { %v89_v19 = vadd.f32 %v113_v17, %v88_v18 }
 0x10b   :  { %114 = vtanh.f32 %v89_v19 }
 0x111   :  { %v115_v20 = vpop.eup %114 }
 0x112   :  { %92 = vst.msk [vmem:[#allocation2] sm:$0xff] %vm30_vm0, %v115_v20 }
 0x113   :  { %103 = dma.vmem_to_hbm [thread:$0]  %s99_s22, 128, %s101_s24, [#allocation3]  }
 0x114   :  { %140 = dma.done.wait [#allocation3], 128  }
 0x115   :  { %141 = vsyncadd [#allocation3], 4294967168 }
 0x116   :  { %108 = vsyncpa [#allocation3], 1 }

</bundles_post_ra>
